<compile_context>
chip_gen: v5e
topology: v5e:2x2
jax: 0.10.0
libtpu: 0.0.40
codegen_flags: <defaults>
</compile_context>

<pallas_src>
import functools

import numpy as np
import jax
import jax.numpy as jnp
from jax.experimental import pallas as pl
from jax.experimental.pallas import tpu as pltpu


def _normalizer_kernel(lo_ref, hi_ref, scale_ref, off_ref, x_ref, o_ref):
    # (1, D) constant vectors broadcast against the (TB, D) tile.
    x = x_ref[...]
    o_ref[...] = (jnp.clip(x, lo_ref[...], hi_ref[...]) * scale_ref[...]
                  + off_ref[...])


def _build_column_constants(D, scan_cols, range_max, max_goal_dist,
                            linvel_range, rotvel_range, dtype):
    """(1, D) lo/hi/scale/offset vectors encoding the per-column transform."""
    big = np.float32(np.finfo(np.float32).max)
    lo = np.full((1, D), -big, np.float32)
    hi = np.full((1, D), big, np.float32)
    scale = np.ones((1, D), np.float32)
    off = np.zeros((1, D), np.float32)

    # Scan columns: clamp(0, range_max) / range_max - 0.5
    lo[0, :scan_cols] = 0.0
    hi[0, :scan_cols] = range_max
    scale[0, :scan_cols] = 1.0 / range_max
    off[0, :scan_cols] = -0.5

    # Goal distance (D-4): x / max_goal_dist - 0.5
    scale[0, D - 4] = 1.0 / max_goal_dist
    off[0, D - 4] = -0.5

    # Goal angle (D-3): passthrough (scale=1, offset=0) -- matches PyTorch.

    # Linear velocity (D-2): (x - lo) / (hi - lo) - 0.5
    lden = float(linvel_range[1]) - float(linvel_range[0])
    assert lden != 0.0, "degenerate linvel_range"
    scale[0, D - 2] = 1.0 / lden
    off[0, D - 2] = -float(linvel_range[0]) / lden - 0.5

    # Rotational velocity (D-1): (x - lo) / (hi - lo) - 0.5
    rden = float(rotvel_range[1]) - float(rotvel_range[0])
    assert rden != 0.0, "degenerate rotvel_range"
    scale[0, D - 1] = 1.0 / rden
    off[0, D - 1] = -float(rotvel_range[0]) / rden - 0.5

    return (jnp.asarray(lo, dtype), jnp.asarray(hi, dtype),
            jnp.asarray(scale, dtype), jnp.asarray(off, dtype))


def high_level_normalizer(preprocessed_obs, *, num_scan_stack, range_max,
                          n_angles, max_goal_dist, linvel_range, rotvel_range,
                          block_rows=None, donate_input=False):
    """Functional equivalent of HighLevelNormalizer.forward.

    Set donate_input=True to reuse the input HBM buffer for the output
    (mirrors PyTorch's in-place mutation); the input must not be read
    afterwards in that case.
    """
    B, D = preprocessed_obs.shape
    scan_cols = num_scan_stack * n_angles
    assert D == scan_cols + 4, "obs width must be num_scan_stack*n_angles + 4"

    dtype = preprocessed_obs.dtype
    lo, hi, scale, off = _build_column_constants(
        D, scan_cols, float(range_max), float(max_goal_dist),
        linvel_range, rotvel_range, dtype)

    # Tile the batch axis; ~1 MiB/buffer at TB=1024 (D pads to 256 lanes),
    # safe on v7x's smaller VMEM while keeping DMA/compute overlap.
    if block_rows is None:
        block_rows = min(B, 1024)
    tb = min(block_rows, B)
    # Block second-to-last dim must be a multiple of 8 or the full extent.
    if tb != B and tb % 8 != 0:
        tb = max(8, (tb // 8) * 8)
    grid = (pl.cdiv(B, tb),)

    vec_spec = pl.BlockSpec((1, D), lambda i: (0, 0))
    obs_spec = pl.BlockSpec((tb, D), lambda i: (i, 0))

    return pl.pallas_call(
        _normalizer_kernel,
        out_shape=jax.ShapeDtypeStruct((B, D), dtype),
        grid_spec=pltpu.PrefetchScalarGridSpec(
            num_scalar_prefetch=0,
            grid=grid,
            in_specs=[vec_spec, vec_spec, vec_spec, vec_spec, obs_spec],
            out_specs=obs_spec,
        ),
        compiler_params=pltpu.CompilerParams(
            dimension_semantics=("parallel",)),
        input_output_aliases=({4: 0} if donate_input else {}),
    )(lo, hi, scale, off, preprocessed_obs)


def _reference(obs, *, num_scan_stack, range_max, n_angles, max_goal_dist,
               linvel_range, rotvel_range):
    """Plain-JAX reference mirroring the PyTorch semantics."""
    obs = jnp.asarray(obs)
    scan = obs[:, :-4]
    scan = jnp.clip(scan, 0.0, range_max) / range_max - 0.5
    other = obs[:, -4:]
    goal = other[:, 0] / max_goal_dist - 0.5
    goal_angle = other[:, 1]
    lin = (other[:, 2] - linvel_range[0]) / (linvel_range[1] - linvel_range[0]) - 0.5
    rot = (other[:, 3] - rotvel_range[0]) / (rotvel_range[1] - rotvel_range[0]) - 0.5
    tail = jnp.stack([goal, goal_angle, lin, rot], axis=1)
    return jnp.concatenate([scan, tail], axis=1)


if __name__ == "__main__":
    # Module hyperparameters (deterministic, no checkpoint needed).
    num_scan_stack = 4
    n_angles = 32
    range_max = 6.0
    max_goal_dist = 10.0
    linvel_range = (0.0, 1.0)
    rotvel_range = (-1.0, 1.0)

    B = 64
    D = num_scan_stack * n_angles + 4  # 132

    key = jax.random.PRNGKey(0)
    obs = jax.random.uniform(key, (B, D), dtype=jnp.float32,
                             minval=-2.0, maxval=8.0)

    # Reference computed first (kernel is functional here, but this keeps the
    # test valid even if donate_input=True is used).
    ref = _reference(
        obs,
        num_scan_stack=num_scan_stack,
        range_max=range_max,
        n_angles=n_angles,
        max_goal_dist=max_goal_dist,
        linvel_range=linvel_range,
        rotvel_range=rotvel_range,
    )

    # Small block_rows so the test exercises a multi-step, pipelined grid.
    out = high_level_normalizer(
        obs,
        num_scan_stack=num_scan_stack,
        range_max=range_max,
        n_angles=n_angles,
        max_goal_dist=max_goal_dist,
        linvel_range=linvel_range,
        rotvel_range=rotvel_range,
        block_rows=16,
    )
    out = jax.block_until_ready(out)

    assert out.shape == obs.shape and out.dtype == obs.dtype
    assert jnp.allclose(out, ref, atol=1e-6, rtol=1e-6)
    print("KERNEL_OK")
</pallas_src>

<mosaic_0001>
module attributes {stable_mosaic.version = 11 : i64} {
  func.func @_normalizer_kernel(%arg0: i32, %arg1: memref<1x132xf32, #tpu.memory_space<vmem>>, %arg2: memref<1x132xf32, #tpu.memory_space<vmem>>, %arg3: memref<1x132xf32, #tpu.memory_space<vmem>>, %arg4: memref<1x132xf32, #tpu.memory_space<vmem>>, %arg5: memref<16x132xf32, #tpu.memory_space<vmem>>, %arg6: memref<16x132xf32, #tpu.memory_space<vmem>>) attributes {dimension_semantics = [#tpu.dimension_semantics<parallel>], iteration_bounds = array<i64: 4>, scalar_prefetch = 0 : i64, scratch_operands = 0 : i64, tpu.core_type = #tpu.core_type<tc>, window_params = [{pipeline_mode = #tpu.pipeline_mode<synchronous>, transform_indices = @transform_0, window_bounds = array<i64: 1, 132>}, {pipeline_mode = #tpu.pipeline_mode<synchronous>, transform_indices = @transform_1, window_bounds = array<i64: 1, 132>}, {pipeline_mode = #tpu.pipeline_mode<synchronous>, transform_indices = @transform_2, window_bounds = array<i64: 1, 132>}, {pipeline_mode = #tpu.pipeline_mode<synchronous>, transform_indices = @transform_3, window_bounds = array<i64: 1, 132>}, {transform_indices = @transform_4, window_bounds = array<i64: 16, 132>}, {transform_indices = @transform_5, window_bounds = array<i64: 16, 132>}]} {
    %c0 = arith.constant 0 : index
    %c0_0 = arith.constant 0 : index
    %0 = vector.load %arg5[%c0, %c0_0] : memref<16x132xf32, #tpu.memory_space<vmem>>, vector<16x132xf32>
    %c0_1 = arith.constant 0 : index
    %c0_2 = arith.constant 0 : index
    %1 = vector.load %arg1[%c0_1, %c0_2] : memref<1x132xf32, #tpu.memory_space<vmem>>, vector<1x132xf32>
    %c0_3 = arith.constant 0 : index
    %c0_4 = arith.constant 0 : index
    %2 = vector.load %arg2[%c0_3, %c0_4] : memref<1x132xf32, #tpu.memory_space<vmem>>, vector<1x132xf32>
    %3 = vector.broadcast %1 : vector<1x132xf32> to vector<16x132xf32>
    %4 = arith.maximumf %3, %0 : vector<16x132xf32>
    %5 = vector.broadcast %2 : vector<1x132xf32> to vector<16x132xf32>
    %6 = arith.minimumf %5, %4 : vector<16x132xf32>
    %c0_5 = arith.constant 0 : index
    %c0_6 = arith.constant 0 : index
    %7 = vector.load %arg3[%c0_5, %c0_6] : memref<1x132xf32, #tpu.memory_space<vmem>>, vector<1x132xf32>
    %8 = vector.broadcast %7 : vector<1x132xf32> to vector<16x132xf32>
    %9 = arith.mulf %6, %8 : vector<16x132xf32>
    %c0_7 = arith.constant 0 : index
    %c0_8 = arith.constant 0 : index
    %10 = vector.load %arg4[%c0_7, %c0_8] : memref<1x132xf32, #tpu.memory_space<vmem>>, vector<1x132xf32>
    %11 = vector.broadcast %10 : vector<1x132xf32> to vector<16x132xf32>
    %12 = arith.addf %9, %11 : vector<16x132xf32>
    %c0_9 = arith.constant 0 : index
    %c0_10 = arith.constant 0 : index
    %13 = vector.load %arg6[%c0_9, %c0_10] : memref<16x132xf32, #tpu.memory_space<vmem>>, vector<16x132xf32>
    tpu.vector_store %arg6[%c0_9, %c0_10], %12 {strides = array<i32>} : memref<16x132xf32, #tpu.memory_space<vmem>>, vector<16x132xf32>,
    return
  }
  func.func @transform_0(%arg0: i32) -> (i32, i32) {
    %c0_i32 = arith.constant 0 : i32
    %c0_i32_0 = arith.constant 0 : i32
    %c0_i32_1 = arith.constant 0 : i32
    return %c0_i32, %c0_i32_0 : i32, i32
  }
  func.func @transform_1(%arg0: i32) -> (i32, i32) {
    %c0_i32 = arith.constant 0 : i32
    %c0_i32_0 = arith.constant 0 : i32
    %c0_i32_1 = arith.constant 0 : i32
    return %c0_i32, %c0_i32_0 : i32, i32
  }
  func.func @transform_2(%arg0: i32) -> (i32, i32) {
    %c0_i32 = arith.constant 0 : i32
    %c0_i32_0 = arith.constant 0 : i32
    %c0_i32_1 = arith.constant 0 : i32
    return %c0_i32, %c0_i32_0 : i32, i32
  }
  func.func @transform_3(%arg0: i32) -> (i32, i32) {
    %c0_i32 = arith.constant 0 : i32
    %c0_i32_0 = arith.constant 0 : i32
    %c0_i32_1 = arith.constant 0 : i32
    return %c0_i32, %c0_i32_0 : i32, i32
  }
  func.func @transform_4(%arg0: i32) -> (i32, i32) {
    %c0_i32 = arith.constant 0 : i32
    %c0_i32_0 = arith.constant 0 : i32
    return %arg0, %c0_i32 : i32, i32
  }
  func.func @transform_5(%arg0: i32) -> (i32, i32) {
    %c0_i32 = arith.constant 0 : i32
    %c0_i32_0 = arith.constant 0 : i32
    return %arg0, %c0_i32 : i32, i32
  }
}

</mosaic_0001>

<bundles_post_ra>
// kernel: tpu_custom_call.1
= control target key start
LH: loop header
LB: loop body
LE: loop exit
PB: predicated region body
PF: predicated region fallthrough
CT: control target
= control target key end

     0   :  { %10 = vsyncpa [#allocation3], 0  ;;  %s957_s0 = inlined_call_operand.hbm [shape: f32[1,132], index: 0, kind: input, shape index: {}]   ;;  %s958_s1 = inlined_call_operand.hbm [shape: f32[1,132], index: 1, kind: input, shape index: {}]   ;;  %s959_s2 = inlined_call_operand.hbm [shape: f32[1,132], index: 2, kind: input, shape index: {}]   ;;  %s960_s3 = inlined_call_operand.vmem [shape: f32[1,132], index: 3, kind: input, shape index: {}]   ;;  %s961_s4 = inlined_call_operand.hbm [shape: f32[64,132], index: 4, kind: input, shape index: {}]   ;;  %s962_s5 = inlined_call_operand.hbm [shape: f32[64,132], index: 5, kind: output, shape index: {}]  }
   0x1   :  { %11 = vsyncpa [#allocation6], 0 }
   0x2   :  { %12 = vsyncpa [#allocation9], 0 }
   0x3   :  { %14 = vsyncpa [#allocation9 + $0x1], 0 }
   0x4   :  { %15 = vsyncpa [#allocation4], 0 }
   0x5   :  { %17 = vsyncpa [#allocation4 + $0x1], 0  ;;  %s802_s18 = smov 0   ;;  %s804_s19 = smov 0  }
   0x6   :  { %s806_s20 = smov 0   ;;  %s808_s21 = smov 0  }
   0x7 LB: > { %s823_s22 = sadd.s32 4294967295, %s763_s21   ;;  %s462_s23 = sadd.s32 4294967294, %s763_s21   ;;  %s763_s21 = sphi %s808_s21, %s971_s21   ;;  %s759_s20 = sphi %s806_s20, %s970_s20   ;;  %s755_s19 = sphi %s804_s19, %s969_s19   ;;  %s751_s18 = sphi %s802_s18, %s968_s18  }
   0x8   : > { %p127_p0 = scmp.ne.s32.totalorder %s755_s19, %s751_s18  ;;  %p128_p1 = scmp.eq.s32.totalorder %s823_s22, 0 }
   0x9   : > { %p151_p2 = scmp.eq.s32.totalorder %s823_s22, 3  ;;  %p157_p3 = scmp.eq.s32.totalorder %s462_s23, 3 }
   0xa   : > { %p832_p4 = por %p128_p1, %p127_p0  ;;  %p463_p5 = scmp.ge.s32.totalorder %s763_s21, 1 }
   0xb   : > { %p837_p6 = por %p157_p3, %p127_p0  ;;  %p164_p7 = scmp.lt.s32.totalorder %s763_s21, 5 }
   0xc   : > { %s188_s28 = sshll.u32 %s958_s1, 4  ;;  %s765_s30 = smov [#allocation5]   ;;  %s189_s28 = int_to_ptr.hbm [resolvable:$true] %s188_s28 }
   0xd   : > { %p845_p8 = pnand %p463_p5, %p164_p7  ;;  %s190_s6 = sshll.u32 %s765_s30, 4  ;;  %s191_s6 = int_to_ptr.vmem [resolvable:$true] %s190_s6 }
   0xe   : > { %s176_s9 = sshll.u32 %s957_s0, 4  ;;  %s200_s12 = sshll.u32 %s959_s2, 4  ;;  %s177_s9 = int_to_ptr.hbm [resolvable:$true] %s176_s9  ;;  %s201_s12 = int_to_ptr.hbm [resolvable:$true] %s200_s12 }
   0xf   : > { %p504_p9 = pneg %p845_p8  ;;  %s766_s13 = smov [#allocation2]  }
  0x10   : > { %s178_s14 = sshll.u32 %s766_s13, 4  ;;  %s767_s15 = smov [#allocation7]   ;;  %s179_s14 = int_to_ptr.vmem [resolvable:$true] %s178_s14 }
  0x11   : > { %p505_p10 = pnand %p504_p9, %p128_p1  ;;  %s202_s16 = sshll.u32 %s767_s15, 4  ;;  %s203_s16 = int_to_ptr.vmem [resolvable:$true] %s202_s16 }
  0x12   : > { %s860_s17 = sadd.s32 1, %s763_s21   ;;  %s114_s26 = sadd.s32 1, %s759_s20 }
  0x13   : > { %510 = dma.hbm_to_vmem [thread:$0]  (!%p505_p10), %s189_s28, 32, %s191_s6, [#allocation6]  }
  0x14   : > { %507 = dma.hbm_to_vmem [thread:$0]  (!%p505_p10), %s177_s9, 32, %s179_s14, [#allocation3]  }
  0x15   : > { %513 = dma.hbm_to_vmem [thread:$0]  (!%p505_p10), %s201_s12, 32, %s203_s16, [#allocation6]  }
  0x16   : > { %s111_s23 = ssub.s32 %s763_s21, %s860_s17  ;;  %p121_p12 = scmp.ne.s32.totalorder %s759_s20, %s755_s19 }
  0x17   : > { %p112_p11 = scmp.eq.s32.totalorder %s111_s23, 0  ;;  %p122_p13 = scmp.eq.s32.totalorder %s763_s21, 0 }
  0x18   : > { %p525_p0 = scmp.lt.s32.totalorder %s763_s21, 4  ;;  %p874_p5 = por %p151_p2, %p121_p12 }
  0x19   : > { %s870_s27 = scalar_select %p112_p11, %s759_s20, %s114_s26  }
  0x1a   : > { %p123_p3 = por %p122_p13, %p121_p12  ;;  %s216_s30 = sand.u32 1, %s759_s20  }
  0x1b   : > { %s485_s6 = sshll.u32 %s763_s21, 5  ;;  %s468_s7 = sshll.u32 %s216_s30, 5 }
  0x1c   : > { %s226_s10 = scalar_lea.hbm %s961_s4, %s485_s6  ;;  %s220_s12 = scalar_lea.vmem [#allocation8], %s468_s7 }
  0x1d   : > { %s227_s11 = sshll.u32 %s226_s10, 4  ;;  %s229_s13 = sshll.u32 %s220_s12, 4  ;;  %s228_s11 = int_to_ptr.hbm [resolvable:$true] %s227_s11  ;;  %s230_s13 = int_to_ptr.vmem [resolvable:$true] %s229_s13 }
  0x1e   : > { %p885_p7 = pnand %p525_p0, %p123_p3  ;;  %s217_s15 = scalar_lea.sflag [#allocation9], %s216_s30 }
  0x1f   : > { %s659_s16 = sshra.s32 %s228_s11, 4  ;;  %s666_s7 = scalar_lea.hbm %s961_s4, 128  ;;  %s660_s16 = int_to_ptr.hbm [resolvable:$true] %s659_s16 }
  0x20   : > { %s661_s23 = scalar_lea.hbm %s660_s16, 32  ;;  %p663_p9 = pneg %p885_p7 }
  0x21   : > { %p662_p2 = scmp.ne.s32.totalorder %s660_s16, %s661_s23  ;;  %p667_p12 = scmp.lt.s32.totalorder %s660_s16, %s961_s4 }
  0x22   : > { %p668_p13 = scmp.lt.s32.totalorder %s666_s7, %s661_s23 }
  0x23   : > { %p664_p10 = pnand %p663_p9, %p662_p2 }
  0x24   : > { %p669_p0 = por %p668_p13, %p667_p12 }
  0x25   : > { %p665_p11 = pneg %p664_p10 }
  0x27   : > { %p670_p3 = pnand %p669_p0, %p665_p11 }
  0x29   : > { %673 = shalt.err (!%p670_p3)
}
  0x2a   : > { %s768_s30 = smov 256   ;;  %s769_s10 = smov 16  }
  0x2b   : > { %517 = dma.hbm_to_vmem [thread:$0]  (!%p885_p7), %s228_s11, 512, %s230_s13, %s217_s15, %s768_s30, %s768_s30, %s769_s10  }
  0x2c   : > { %241 = sbr.rel (%p845_p8) target bundleno = 74 (0x4a), region = 40 }
  0x31   : > { %734 = dma.done.wait (%p128_p1), [#allocation3], 32  }
  0x32   : > { %736 = vsyncadd (%p128_p1), [#allocation3], 4294967264 }
  0x33   : > { %738 = dma.done.wait (%p128_p1), [#allocation6], 64  }
  0x34   : > { %740 = vsyncadd (%p128_p1), [#allocation6], 4294967232  ;;  %s910_s12 = sand.u32 1, %s755_s19  }
  0x35   : > { %s476_s29 = sshll.u32 %s910_s12, 5  ;;  %s259_s11 = scalar_lea.sflag [#allocation9], %s910_s12 }
  0x36   : > { %s262_s13 = scalar_lea.vmem [#allocation8], %s476_s29 }
  0x37   : > { %742 = dma.done.wait (%p832_p4), %s259_s11, 512  }
  0x38   : > { %744 = vsyncadd (%p832_p4), %s259_s11, 4294966784  ;;  %v292_v0 = vld [vmem:[%s262_s13] sm:$0xff]  ;;  %v296_v1 = vld [vmem:[#allocation2] sm:$0x3]  ;;  %s487_s24 = sshll.u32 %s823_s22, 5  ;;  %s289_s6 = scalar_lea.vmem [#allocation10], %s476_s29 }
  0x39   : > { %v297_v2 = vld [vmem:[#allocation5] sm:$0x3]  ;;  %v299_v3 = vperm.slane %v296_v1, 0  ;;  %v300_v4 = vperm.slane %v296_v1, 1  ;;  %v316_v7 = vld [vmem:[#allocation7] sm:$0x3]  ;;  %s354_s26 = scalar_lea.hbm %s962_s5, %s487_s24 }
  0x3a   : > { %v308_v5 = vperm.slane %v297_v2, 0  ;;  %v309_v6 = vperm.slane %v297_v2, 1  ;;  %v326_v8 = vld [vmem:[%s960_s3] sm:$0x3]  ;;  %v293_v9 = vld [vmem:[%s262_s13 + $0x8] sm:$0xff]  ;;  %v294_v10 = vld [vmem:[%s262_s13 + $0x10] sm:$0xff] }
  0x3b   : > { %v303_v11 = vmax.f32 %v299_v3, %v292_v0  ;;  %v318_v12 = vperm.slane %v316_v7, 0  ;;  %v319_v13 = vperm.slane %v316_v7, 1  ;;  %v304_v14 = vmax.f32 %v300_v4, %v293_v9  ;;  %v295_v15 = vld [vmem:[%s262_s13 + $0x18] sm:$0xff]  ;;  %s355_s7 = sshll.u32 %s289_s6, 4  ;;  %s357_s22 = sshll.u32 %s354_s26, 4  ;;  %s356_s7 = int_to_ptr.vmem [resolvable:$true] %s355_s7  ;;  %s358_s22 = int_to_ptr.hbm [resolvable:$true] %s357_s22 }
  0x3c   : > { %v305_v16 = vmax.f32 %v299_v3, %v294_v10  ;;  %v306_v17 = vmax.f32 %v300_v4, %v295_v15  ;;  %v328_v19 = vperm.slane %v326_v8, 0  ;;  %v329_v20 = vperm.slane %v326_v8, 1  ;;  %s342_s8 = scalar_lea.sflag [#allocation4], %s910_s12  ;;  %s703_s9 = sshra.s32 %s358_s22, 4  ;;  %s704_s9 = int_to_ptr.hbm [resolvable:$true] %s703_s9 }
  0x3d   : > { %v312_v18 = vmin.f32 %v308_v5, %v303_v11  ;;  %v313_v21 = vmin.f32 %v309_v6, %v304_v14  ;;  %vm337_vm0 = vcmask 31744   ;;  %s705_s30 = scalar_lea.hbm %s704_s9, 32  ;;  %s709_s11 = scalar_lea.hbm %s962_s5, 128 }
  0x3e   : > { %v314_v22 = vmin.f32 %v308_v5, %v305_v16  ;;  %v315_v23 = vmin.f32 %v309_v6, %v306_v17  ;;  %p706_p1 = scmp.ne.s32.totalorder %s704_s9, %s705_s30  ;;  %p710_p7 = scmp.lt.s32.totalorder %s704_s9, %s962_s5 }
  0x3f   : > { %v322_v24 = vmul.f32 %v318_v12, %v312_v18  ;;  %v323_v25 = vmul.f32 %v319_v13, %v313_v21  ;;  %p711_p2 = scmp.lt.s32.totalorder %s709_s11, %s705_s30 }
  0x40   : > { %v324_v26 = vmul.f32 %v318_v12, %v314_v22  ;;  %v325_v27 = vmul.f32 %v319_v13, %v315_v23  ;;  %p707_p4 = pnand %p706_p1, %p874_p5 }
  0x41   : > { %v332_v28 = vadd.f32 %v328_v19, %v322_v24  ;;  %v333_v29 = vadd.f32 %v329_v20, %v323_v25  ;;  %p712_p9 = por %p711_p2, %p710_p7 }
  0x42   : > { %v334_v30 = vadd.f32 %v328_v19, %v324_v26  ;;  %v335_v31 = vadd.f32 %v329_v20, %v325_v27  ;;  %p708_p8 = pneg %p707_p4 }
  0x43   : > { %336 = vst [vmem:[%s289_s6] sm:$0xff] %v332_v28 }
  0x44   : > { %338 = vst.msk [vmem:[%s289_s6 + $0x8] sm:$0xff] %vm337_vm0, %v333_v29  ;;  %p713_p10 = pnand %p712_p9, %p708_p8 }
  0x45   : > { %339 = vst [vmem:[%s289_s6 + $0x10] sm:$0xff] %v334_v30 }
  0x46   : > { %340 = vst.msk [vmem:[%s289_s6 + $0x18] sm:$0xff] %vm337_vm0, %v335_v31 }
  0x47   : > { %716 = shalt.err (!%p713_p10)
}
  0x48   : > { %s770_s12 = smov 256   ;;  %s771_s15 = smov 16  }
  0x49   : > { %502 = dma.vmem_to_hbm [thread:$0]  (%p874_p5), %s356_s7, 512, %s358_s22, %s342_s8, %s770_s12, %s770_s12, %s771_s15  }
  0x4a PF: > { %p529_p11 = scmp.ge.s32.totalorder %s763_s21, 2  ;;  %s372_s24 = sand.u32 1, %s751_s18  }
  0x4b   : > { %s373_s16 = scalar_lea.sflag [#allocation4], %s372_s24 }
  0x4c   : > { %p519_p12 = pnand %p529_p11, %p837_p6 }
  0x4e   : > { %p520_p13 = pneg %p519_p12 }
  0x50   : > { %746 = dma.done.wait (%p520_p13), %s373_s16, 512  }
  0x51   : > { %748 = vsyncadd (%p520_p13), %s373_s16, 4294966784  ;;  %p20_p0 = scmp.ge.s32.totalorder %s860_s17, 6   ;;  %s968_s18 = smov %s755_s19 }
  0x52   : > { %s969_s19 = smov %s759_s20  ;;  %s970_s20 = smov %s870_s27 }
  0x53   : > { %s971_s21 = smov %s860_s17  ;;  %22 = sbr.rel (!%p20_p0) target bundleno = 7 (0x7), region = 98 }
  0x58   :  { %379 = vsyncpa [#allocation3], 1 }
  0x59   :  { %381 = vsyncpa [#allocation3 + $0x1], 1 }
  0x5a   :  { %382 = vsyncpa [#allocation6], 1 }
  0x5b   :  { %383 = vsyncpa [#allocation9], 1 }
  0x5c   :  { %385 = vsyncpa [#allocation9 + $0x1], 1 }
  0x5d   :  { %386 = vsyncpa [#allocation4], 1 }
  0x5e   :  { %388 = vsyncpa [#allocation4 + $0x1], 1 }

</bundles_post_ra>
